<compile_context>
chip_gen: v5e
topology: v5e:2x2
jax: 0.10.0
libtpu: 0.0.40
codegen_flags: <defaults>
</compile_context>

<pallas_src>
import functools

import jax
import jax.numpy as jnp
from jax.experimental import pallas as pl
from jax.experimental.pallas import tpu as pltpu


def _af2_kernel(s_ref, t_ref, w1_ref, sh1_ref, w2_ref, sh2_ref, out_ref,
                *, nb, dim):
    # Stage 1: all branches at once.  (B, dim) @ (dim, nb*inter) -> (B, nb*inter)
    h = jnp.dot(s_ref[...], w1_ref[...], preferred_element_type=jnp.float32)
    h = jnp.maximum(h + sh1_ref[...], 0.0)

    # Stage 2: block-diagonal weight keeps branches separate.
    # (B, nb*inter) @ (nb*inter, nb*dim) -> (B, nb*dim)
    o = jnp.dot(h, w2_ref[...], preferred_element_type=jnp.float32)
    w = jax.nn.sigmoid(o + sh2_ref[...])                  # (B, nb*dim)

    # Weighted sum over branches; slices are lane-aligned (multiples of dim=128).
    prod = w * t_ref[...]                                  # (B, nb*dim)
    acc = prod[:, 0:dim]
    for j in range(1, nb):
        acc = acc + prod[:, j * dim:(j + 1) * dim]
    out_ref[...] = 3.0 * acc


def af2_forward(t, params):
    B, nb, dim = t.shape
    inter = params['w1'].shape[1]

    w1, w2 = params['w1'], params['w2']                    # (nb,inter,dim), (nb,dim,inter)
    scale1, shift1 = params['scale1'], params['shift1']    # (nb, inter)
    scale2, shift2 = params['scale2'], params['shift2']    # (nb, dim)

    # Fold BN scales into the conv weights (exact) and stack across branches.
    w1f = scale1[:, :, None] * w1                          # (nb, inter, dim)
    w1_all = jnp.transpose(w1f, (2, 0, 1)).reshape(dim, nb * inter)
    sh1_all = shift1.reshape(1, nb * inter)

    w2f = scale2[:, :, None] * w2                          # (nb, dim, inter)
    w2t = jnp.transpose(w2f, (0, 2, 1))                    # (nb, inter, dim)
    w2_bd = jnp.zeros((nb * inter, nb * dim), jnp.float32)
    for j in range(nb):
        w2_bd = w2_bd.at[j * inter:(j + 1) * inter,
                         j * dim:(j + 1) * dim].set(w2t[j])
    sh2_all = shift2.reshape(1, nb * dim)

    s = jnp.sum(t, axis=1)                                 # (B, dim)
    t_flat = t.reshape(B, nb * dim)                        # contiguous, no copy

    kernel = functools.partial(_af2_kernel, nb=nb, dim=dim)
    return pl.pallas_call(
        kernel,
        out_shape=jax.ShapeDtypeStruct((B, dim), jnp.float32),
        grid_spec=pltpu.PrefetchScalarGridSpec(
            num_scalar_prefetch=0,
            grid=(1,),
            in_specs=[
                pl.BlockSpec((B, dim), lambda i: (0, 0)),               # s
                pl.BlockSpec((B, nb * dim), lambda i: (0, 0)),          # t flat
                pl.BlockSpec((dim, nb * inter), lambda i: (0, 0)),      # W1 stacked
                pl.BlockSpec((1, nb * inter), lambda i: (0, 0)),        # shift1
                pl.BlockSpec((nb * inter, nb * dim), lambda i: (0, 0)), # W2 block-diag
                pl.BlockSpec((1, nb * dim), lambda i: (0, 0)),          # shift2
            ],
            out_specs=pl.BlockSpec((B, dim), lambda i: (0, 0)),
        ),
        compiler_params=pltpu.CompilerParams(
            dimension_semantics=("arbitrary",)),
    )(s, t_flat, w1_all, sh1_all, w2_bd, sh2_all)


def make_params(key, nb, dim, r=4, eps=1e-5):
    """Deterministic synthetic parameters; eval-mode BN folded into scale/shift."""
    inter = dim // r
    ks = jax.random.split(key, 12)
    # Conv1d(dim, inter, 1) weights (k=1 axis squeezed) and biases, per branch.
    w1 = jax.random.normal(ks[0], (nb, inter, dim), jnp.float32) * 0.1
    b1 = jax.random.normal(ks[1], (nb, inter), jnp.float32) * 0.05
    w2 = jax.random.normal(ks[2], (nb, dim, inter), jnp.float32) * 0.1
    b2 = jax.random.normal(ks[3], (nb, dim), jnp.float32) * 0.05
    # BatchNorm1d(inter) / BatchNorm1d(dim) eval-mode statistics.
    g1 = 1.0 + 0.1 * jax.random.normal(ks[4], (nb, inter), jnp.float32)
    be1 = 0.05 * jax.random.normal(ks[5], (nb, inter), jnp.float32)
    m1 = 0.1 * jax.random.normal(ks[6], (nb, inter), jnp.float32)
    v1 = 0.5 + jax.random.uniform(ks[7], (nb, inter), jnp.float32)
    g2 = 1.0 + 0.1 * jax.random.normal(ks[8], (nb, dim), jnp.float32)
    be2 = 0.05 * jax.random.normal(ks[9], (nb, dim), jnp.float32)
    m2 = 0.1 * jax.random.normal(ks[10], (nb, dim), jnp.float32)
    v2 = 0.5 + jax.random.uniform(ks[11], (nb, dim), jnp.float32)

    scale1 = g1 / jnp.sqrt(v1 + eps)
    shift1 = (b1 - m1) * scale1 + be1
    scale2 = g2 / jnp.sqrt(v2 + eps)
    shift2 = (b2 - m2) * scale2 + be2

    return {
        'w1': w1, 'scale1': scale1, 'shift1': shift1,
        'w2': w2, 'scale2': scale2, 'shift2': shift2,
    }


def af2_reference(t, params):
    """Pure-JAX reference mirroring the PyTorch forward (eval-mode BN)."""
    s = jnp.sum(t, axis=1)                                           # (B, dim)
    h = jnp.einsum('bd,jid->jbi', s, params['w1'])                   # (nb, B, inter)
    h = jnp.maximum(h * params['scale1'][:, None, :]
                    + params['shift1'][:, None, :], 0.0)
    o = jnp.einsum('jbi,jdi->jbd', h, params['w2'])                  # (nb, B, dim)
    o = o * params['scale2'][:, None, :] + params['shift2'][:, None, :]
    w = jax.nn.sigmoid(o)
    r = 3.0 * jnp.sum(w * jnp.transpose(t, (1, 0, 2)), axis=0)       # (B, dim)
    return r


if __name__ == "__main__":
    B, nb, dim, rr = 8, 4, 128, 4   # small shapes consistent with AF_2(channel=nb, dim, r)
    key = jax.random.PRNGKey(0)
    k_t, k_p = jax.random.split(key)
    t = jax.random.normal(k_t, (B, nb, dim), jnp.float32)
    params = make_params(k_p, nb, dim, rr)

    out = jax.jit(af2_forward)(t, params)
    out = jax.block_until_ready(out)

    ref = jax.block_until_ready(af2_reference(t, params))
    assert out.shape == (B, dim)
    assert jnp.allclose(out, ref, rtol=1e-3, atol=1e-3), (
        f"max abs diff {jnp.max(jnp.abs(out - ref))}")
    print("KERNEL_OK")
</pallas_src>

<mosaic_0001>
module attributes {stable_mosaic.version = 11 : i64} {
  func.func @_af2_kernel(%arg0: i32, %arg1: memref<8x128xf32, #tpu.memory_space<vmem>>, %arg2: memref<8x512xf32, #tpu.memory_space<vmem>>, %arg3: memref<128x128xf32, #tpu.memory_space<vmem>>, %arg4: memref<1x128xf32, #tpu.memory_space<vmem>>, %arg5: memref<128x512xf32, #tpu.memory_space<vmem>>, %arg6: memref<1x512xf32, #tpu.memory_space<vmem>>, %arg7: memref<8x128xf32, #tpu.memory_space<vmem>>) attributes {dimension_semantics = [#tpu.dimension_semantics<arbitrary>], iteration_bounds = array<i64: 1>, scalar_prefetch = 0 : i64, scratch_operands = 0 : i64, tpu.core_type = #tpu.core_type<tc>, window_params = [{pipeline_mode = #tpu.pipeline_mode<synchronous>, transform_indices = @transform_0, window_bounds = array<i64: 8, 128>}, {pipeline_mode = #tpu.pipeline_mode<synchronous>, transform_indices = @transform_1, window_bounds = array<i64: 8, 512>}, {pipeline_mode = #tpu.pipeline_mode<synchronous>, transform_indices = @transform_2, window_bounds = array<i64: 128, 128>}, {pipeline_mode = #tpu.pipeline_mode<synchronous>, transform_indices = @transform_3, window_bounds = array<i64: 1, 128>}, {pipeline_mode = #tpu.pipeline_mode<synchronous>, transform_indices = @transform_4, window_bounds = array<i64: 128, 512>}, {pipeline_mode = #tpu.pipeline_mode<synchronous>, transform_indices = @transform_5, window_bounds = array<i64: 1, 512>}, {pipeline_mode = #tpu.pipeline_mode<synchronous>, transform_indices = @transform_6, window_bounds = array<i64: 8, 128>}]} {
    %c0 = arith.constant 0 : index
    %c0_0 = arith.constant 0 : index
    %0 = vector.load %arg1[%c0, %c0_0] : memref<8x128xf32, #tpu.memory_space<vmem>>, vector<8x128xf32>
    %c0_1 = arith.constant 0 : index
    %c0_2 = arith.constant 0 : index
    %1 = vector.load %arg3[%c0_1, %c0_2] : memref<128x128xf32, #tpu.memory_space<vmem>>, vector<128x128xf32>
    %cst = arith.constant dense<0.000000e+00> : vector<8x128xf32>
    %2 = tpu.matmul %0, %1, %cst {dimension_numbers = #tpu.dot_dimension_numbers<[1], [0], [0], [1], [0, 0, 1, 1], [], []>} : vector<8x128xf32>, vector<128x128xf32>, vector<8x128xf32> -> vector<8x128xf32>
    %c0_3 = arith.constant 0 : index
    %c0_4 = arith.constant 0 : index
    %3 = vector.load %arg4[%c0_3, %c0_4] : memref<1x128xf32, #tpu.memory_space<vmem>>, vector<1x128xf32>
    %4 = vector.broadcast %3 : vector<1x128xf32> to vector<8x128xf32>
    %5 = arith.addf %2, %4 : vector<8x128xf32>
    %cst_5 = arith.constant 0.000000e+00 : f32
    %6 = vector.broadcast %cst_5 : f32 to vector<8x128xf32>
    %7 = arith.maximumf %5, %6 : vector<8x128xf32>
    %c0_6 = arith.constant 0 : index
    %c0_7 = arith.constant 0 : index
    %8 = vector.load %arg5[%c0_6, %c0_7] : memref<128x512xf32, #tpu.memory_space<vmem>>, vector<128x512xf32>
    %cst_8 = arith.constant dense<0.000000e+00> : vector<8x512xf32>
    %9 = tpu.matmul %7, %8, %cst_8 {dimension_numbers = #tpu.dot_dimension_numbers<[1], [0], [0], [1], [0, 0, 1, 1], [], []>} : vector<8x128xf32>, vector<128x512xf32>, vector<8x512xf32> -> vector<8x512xf32>
    %c0_9 = arith.constant 0 : index
    %c0_10 = arith.constant 0 : index
    %10 = vector.load %arg6[%c0_9, %c0_10] : memref<1x512xf32, #tpu.memory_space<vmem>>, vector<1x512xf32>
    %11 = vector.broadcast %10 : vector<1x512xf32> to vector<8x512xf32>
    %12 = arith.addf %9, %11 : vector<8x512xf32>
    %13 = arith.negf %12 : vector<8x512xf32>
    %14 = math.exp %13 : vector<8x512xf32>
    %cst_11 = arith.constant 1.000000e+00 : f32
    %15 = vector.broadcast %cst_11 : f32 to vector<8x512xf32>
    %16 = arith.addf %15, %14 : vector<8x512xf32>
    %17 = arith.divf %15, %16 : vector<8x512xf32>
    %c0_12 = arith.constant 0 : index
    %c0_13 = arith.constant 0 : index
    %18 = vector.load %arg2[%c0_12, %c0_13] : memref<8x512xf32, #tpu.memory_space<vmem>>, vector<8x512xf32>
    %19 = arith.mulf %17, %18 : vector<8x512xf32>
    %20 = vector.extract_strided_slice %19 {offsets = [0, 0], sizes = [8, 128], strides = [1, 1]} : vector<8x512xf32> to vector<8x128xf32>
    %21 = vector.extract_strided_slice %19 {offsets = [0, 128], sizes = [8, 128], strides = [1, 1]} : vector<8x512xf32> to vector<8x128xf32>
    %22 = arith.addf %20, %21 : vector<8x128xf32>
    %23 = vector.extract_strided_slice %19 {offsets = [0, 256], sizes = [8, 128], strides = [1, 1]} : vector<8x512xf32> to vector<8x128xf32>
    %24 = arith.addf %22, %23 : vector<8x128xf32>
    %25 = vector.extract_strided_slice %19 {offsets = [0, 384], sizes = [8, 128], strides = [1, 1]} : vector<8x512xf32> to vector<8x128xf32>
    %26 = arith.addf %24, %25 : vector<8x128xf32>
    %cst_14 = arith.constant 3.000000e+00 : f32
    %27 = vector.broadcast %cst_14 : f32 to vector<8x128xf32>
    %28 = arith.mulf %27, %26 : vector<8x128xf32>
    %c0_15 = arith.constant 0 : index
    %c0_16 = arith.constant 0 : index
    %29 = vector.load %arg7[%c0_15, %c0_16] : memref<8x128xf32, #tpu.memory_space<vmem>>, vector<8x128xf32>
    tpu.vector_store %arg7[%c0_15, %c0_16], %28 {strides = array<i32>} : memref<8x128xf32, #tpu.memory_space<vmem>>, vector<8x128xf32>,
    return
  }
  func.func @transform_0(%arg0: i32) -> (i32, i32) {
    %c0_i32 = arith.constant 0 : i32
    %c0_i32_0 = arith.constant 0 : i32
    %c0_i32_1 = arith.constant 0 : i32
    return %c0_i32, %c0_i32_0 : i32, i32
  }
  func.func @transform_1(%arg0: i32) -> (i32, i32) {
    %c0_i32 = arith.constant 0 : i32
    %c0_i32_0 = arith.constant 0 : i32
    %c0_i32_1 = arith.constant 0 : i32
    return %c0_i32, %c0_i32_0 : i32, i32
  }
  func.func @transform_2(%arg0: i32) -> (i32, i32) {
    %c0_i32 = arith.constant 0 : i32
    %c0_i32_0 = arith.constant 0 : i32
    %c0_i32_1 = arith.constant 0 : i32
    return %c0_i32, %c0_i32_0 : i32, i32
  }
  func.func @transform_3(%arg0: i32) -> (i32, i32) {
    %c0_i32 = arith.constant 0 : i32
    %c0_i32_0 = arith.constant 0 : i32
    %c0_i32_1 = arith.constant 0 : i32
    return %c0_i32, %c0_i32_0 : i32, i32
  }
  func.func @transform_4(%arg0: i32) -> (i32, i32) {
    %c0_i32 = arith.constant 0 : i32
    %c0_i32_0 = arith.constant 0 : i32
    %c0_i32_1 = arith.constant 0 : i32
    return %c0_i32, %c0_i32_0 : i32, i32
  }
  func.func @transform_5(%arg0: i32) -> (i32, i32) {
    %c0_i32 = arith.constant 0 : i32
    %c0_i32_0 = arith.constant 0 : i32
    %c0_i32_1 = arith.constant 0 : i32
    return %c0_i32, %c0_i32_0 : i32, i32
  }
  func.func @transform_6(%arg0: i32) -> (i32, i32) {
    %c0_i32 = arith.constant 0 : i32
    %c0_i32_0 = arith.constant 0 : i32
    %c0_i32_1 = arith.constant 0 : i32
    return %c0_i32, %c0_i32_0 : i32, i32
  }
}

</mosaic_0001>

<bundles_post_ra>
// kernel: af2_forward.1
= control target key start
LH: loop header
LB: loop body
LE: loop exit
PB: predicated region body
PF: predicated region fallthrough
CT: control target
= control target key end

     0   :  { %s695_s0 = inlined_call_operand.vmem [shape: f32[8,128], index: 0, kind: input, shape index: {}]   ;;  %s696_s1 = inlined_call_operand.vmem [shape: f32[8,512], index: 1, kind: input, shape index: {}]   ;;  %s697_s2 = inlined_call_operand.vmem [shape: f32[128,128], index: 2, kind: input, shape index: {}]   ;;  %s698_s3 = inlined_call_operand.vmem [shape: f32[1,128], index: 3, kind: input, shape index: {}]   ;;  %s699_s4 = inlined_call_operand.vmem [shape: f32[128,512], index: 4, kind: input, shape index: {}]   ;;  %s700_s5 = inlined_call_operand.vmem [shape: f32[1,512], index: 5, kind: input, shape index: {}]   ;;  %s701_s6 = inlined_call_operand.hbm [shape: f32[8,128], index: 6, kind: output, shape index: {}]  }
   0x1   :  { %v40_v0 = vld [vmem:[%s697_s2 + $0x78] sm:$0xff]  ;;  %v39_v1 = vld [vmem:[%s697_s2 + $0x70] sm:$0xff]  ;;  %v38_v2 = vld [vmem:[%s697_s2 + $0x68] sm:$0xff] }
   0x2   :  { %45 = vmatpush.msra.mxu0 %v40_v0  ;;  %v37_v3 = vld [vmem:[%s697_s2 + $0x60] sm:$0xff]  ;;  %v36_v5 = vld [vmem:[%s697_s2 + $0x58] sm:$0xff]  ;;  %v127_v6 = vld [vmem:[%s699_s4 + $0x1e8] sm:$0xff] }
   0x3   :  { %v126_v4 = vld [vmem:[%s699_s4 + $0x1e0] sm:$0xff]  ;;  %v128_v7 = vld [vmem:[%s699_s4 + $0x1f0] sm:$0xff]  ;;  %160 = vmatpush.msra.mxu2 %v127_v6  ;;  %v123_v9 = vld [vmem:[%s699_s4 + $0x1c8] sm:$0xff] }
   0x4   :  { %46 = vmatpush.msra.mxu0 %v39_v1  ;;  %140 = vmatpush.msra.mxu1 %v126_v4  ;;  %v122_v8 = vld [vmem:[%s699_s4 + $0x1c0] sm:$0xff]  ;;  %v124_v10 = vld [vmem:[%s699_s4 + $0x1d0] sm:$0xff]  ;;  %v119_v13 = vld [vmem:[%s699_s4 + $0x1a8] sm:$0xff] }
   0x5   :  { %v35_v11 = vld [vmem:[%s697_s2 + $0x50] sm:$0xff]  ;;  %180 = vmatpush.msra.mxu3 %v128_v7  ;;  %v118_v12 = vld [vmem:[%s699_s4 + $0x1a0] sm:$0xff]  ;;  %161 = vmatpush.msra.mxu2 %v123_v9  ;;  %v34_v16 = vld [vmem:[%s697_s2 + $0x48] sm:$0xff] }
   0x6   :  { %47 = vmatpush.msra.mxu0 %v38_v2  ;;  %141 = vmatpush.msra.mxu1 %v122_v8  ;;  %v120_v14 = vld [vmem:[%s699_s4 + $0x1b0] sm:$0xff]  ;;  %v114_v15 = vld [vmem:[%s699_s4 + $0x180] sm:$0xff]  ;;  %v115_v17 = vld [vmem:[%s699_s4 + $0x188] sm:$0xff] }
   0x7   :  { %181 = vmatpush.msra.mxu3 %v124_v10  ;;  %162 = vmatpush.msra.mxu2 %v119_v13  ;;  %v116_v18 = vld [vmem:[%s699_s4 + $0x190] sm:$0xff]  ;;  %v110_v19 = vld [vmem:[%s699_s4 + $0x160] sm:$0xff]  ;;  %v111_v21 = vld [vmem:[%s699_s4 + $0x168] sm:$0xff] }
   0x8   :  { %48 = vmatpush.msra.mxu0 %v37_v3  ;;  %142 = vmatpush.msra.mxu1 %v118_v12  ;;  %v33_v20 = vld [vmem:[%s697_s2 + $0x40] sm:$0xff]  ;;  %v112_v22 = vld [vmem:[%s699_s4 + $0x170] sm:$0xff]  ;;  %v32_v24 = vld [vmem:[%s697_s2 + $0x38] sm:$0xff] }
   0x9   :  { %182 = vmatpush.msra.mxu3 %v120_v14  ;;  %163 = vmatpush.msra.mxu2 %v115_v17  ;;  %v106_v23 = vld [vmem:[%s699_s4 + $0x140] sm:$0xff]  ;;  %v107_v25 = vld [vmem:[%s699_s4 + $0x148] sm:$0xff]  ;;  %v108_v26 = vld [vmem:[%s699_s4 + $0x150] sm:$0xff] }
   0xa   :  { %49 = vmatpush.msra.mxu0 %v36_v5  ;;  %143 = vmatpush.msra.mxu1 %v114_v15  ;;  %v102_v27 = vld [vmem:[%s699_s4 + $0x120] sm:$0xff]  ;;  %v31_v28 = vld [vmem:[%s697_s2 + $0x30] sm:$0xff]  ;;  %v103_v29 = vld [vmem:[%s699_s4 + $0x128] sm:$0xff] }
   0xb   :  { %183 = vmatpush.msra.mxu3 %v116_v18  ;;  %164 = vmatpush.msra.mxu2 %v111_v21  ;;  %v104_v30 = vld [vmem:[%s699_s4 + $0x130] sm:$0xff]  ;;  %v98_v31 = vld [vmem:[%s699_s4 + $0x100] sm:$0xff]  ;;  %v30_v32 = vld [vmem:[%s697_s2 + $0x28] sm:$0xff] }
   0xc   :  { %50 = vmatpush.msra.mxu0 %v35_v11  ;;  %144 = vmatpush.msra.mxu1 %v110_v19  ;;  %v99_v33 = vld [vmem:[%s699_s4 + $0x108] sm:$0xff]  ;;  %v29_v34 = vld [vmem:[%s697_s2 + $0x20] sm:$0xff]  ;;  %v100_v35 = vld [vmem:[%s699_s4 + $0x110] sm:$0xff] }
   0xd   :  { %184 = vmatpush.msra.mxu3 %v112_v22  ;;  %165 = vmatpush.msra.mxu2 %v107_v25  ;;  %v94_v36 = vld [vmem:[%s699_s4 + $0xe0] sm:$0xff]  ;;  %v95_v37 = vld [vmem:[%s699_s4 + $0xe8] sm:$0xff] }
   0xe   :  { %51 = vmatpush.msra.mxu0 %v34_v16  ;;  %145 = vmatpush.msra.mxu1 %v106_v23 }
   0xf   :  { %185 = vmatpush.msra.mxu3 %v108_v26  ;;  %166 = vmatpush.msra.mxu2 %v103_v29 }
  0x10   :  { %52 = vmatpush.msra.mxu0 %v33_v20  ;;  %146 = vmatpush.msra.mxu1 %v102_v27 }
  0x11   :  { %186 = vmatpush.msra.mxu3 %v104_v30 }
  0x12   :  { %53 = vmatpush.msra.mxu0 %v32_v24  ;;  %147 = vmatpush.msra.mxu1 %v98_v31 }
  0x14   :  { %54 = vmatpush.msra.mxu0 %v31_v28 }
  0x15   :  { %11 = vsyncpa [#allocation3], 0  ;;  %167 = vmatpush.msra.mxu2 %v99_v33  ;;  %v96_v38 = vld [vmem:[%s699_s4 + $0xf0] sm:$0xff]  ;;  %v90_v39 = vld [vmem:[%s699_s4 + $0xc0] sm:$0xff]  ;;  %187 = vmatpush.msra.mxu3 %v100_v35  ;;  %s373_s18 = smov [#allocation2]   ;;  %s316_s22 = sshll.u32 %s701_s6, 4  ;;  %s317_s22 = int_to_ptr.hbm [resolvable:$true] %s316_s22 }
  0x16   :  { %55 = vmatpush.msra.mxu0 %v30_v32  ;;  %v28_v40 = vld [vmem:[%s697_s2 + $0x18] sm:$0xff]  ;;  %148 = vmatpush.msra.mxu1 %v94_v36  ;;  %v91_v41 = vld [vmem:[%s699_s4 + $0xc8] sm:$0xff]  ;;  %v92_v42 = vld [vmem:[%s699_s4 + $0xd0] sm:$0xff]  ;;  %s314_s19 = sshll.u32 %s373_s18, 4  ;;  %s315_s19 = int_to_ptr.vmem [resolvable:$true] %s314_s19 }
  0x17   :  { %168 = vmatpush.msra.mxu2 %v95_v37  ;;  %v86_v43 = vld [vmem:[%s699_s4 + $0xa0] sm:$0xff]  ;;  %v27_v44 = vld [vmem:[%s697_s2 + $0x10] sm:$0xff]  ;;  %188 = vmatpush.msra.mxu3 %v96_v38  ;;  %v87_v45 = vld [vmem:[%s699_s4 + $0xa8] sm:$0xff] }
  0x18   :  { %56 = vmatpush.msra.mxu0 %v29_v34  ;;  %149 = vmatpush.msra.mxu1 %v90_v39  ;;  %v88_v46 = vld [vmem:[%s699_s4 + $0xb0] sm:$0xff]  ;;  %v82_v47 = vld [vmem:[%s699_s4 + $0x80] sm:$0xff]  ;;  %v26_v48 = vld [vmem:[%s697_s2 + $0x8] sm:$0xff] }
  0x19   :  { %169 = vmatpush.msra.mxu2 %v91_v41  ;;  %189 = vmatpush.msra.mxu3 %v92_v42  ;;  %v83_v49 = vld [vmem:[%s699_s4 + $0x88] sm:$0xff]  ;;  %v84_v50 = vld [vmem:[%s699_s4 + $0x90] sm:$0xff]  ;;  %v78_v51 = vld [vmem:[%s699_s4 + $0x60] sm:$0xff] }
  0x1a   :  { %57 = vmatpush.msra.mxu0 %v28_v40  ;;  %150 = vmatpush.msra.mxu1 %v86_v43  ;;  %v25_v52 = vld [vmem:[%s697_s2] sm:$0xff]  ;;  %v79_v53 = vld [vmem:[%s699_s4 + $0x68] sm:$0xff]  ;;  %v80_v55 = vld [vmem:[%s699_s4 + $0x70] sm:$0xff] }
  0x1b   :  { %170 = vmatpush.msra.mxu2 %v87_v45  ;;  %190 = vmatpush.msra.mxu3 %v88_v46  ;;  %v24_v54 = vld [vmem:[%s695_s0] sm:$0xff]  ;;  %v129_v56 = vld [vmem:[%s699_s4 + $0x1f8] sm:$0xff]  ;;  %v75_v6 = vld [vmem:[%s699_s4 + $0x48] sm:$0xff] }
  0x1c   :  { %58 = vmatpush.msra.mxu0 %v27_v44  ;;  %151 = vmatpush.msra.mxu1 %v82_v47  ;;  %v125_v57 = vld [vmem:[%s699_s4 + $0x1d8] sm:$0xff]  ;;  %v74_v5 = vld [vmem:[%s699_s4 + $0x40] sm:$0xff]  ;;  %v76_v7 = vld [vmem:[%s699_s4 + $0x50] sm:$0xff] }
  0x1d   :  { %171 = vmatpush.msra.mxu2 %v83_v49  ;;  %191 = vmatpush.msra.mxu3 %v84_v50  ;;  %v121_v58 = vld [vmem:[%s699_s4 + $0x1b8] sm:$0xff]  ;;  %v70_v9 = vld [vmem:[%s699_s4 + $0x20] sm:$0xff]  ;;  %v71_v10 = vld [vmem:[%s699_s4 + $0x28] sm:$0xff] }
  0x1e   :  { %59 = vmatpush.msra.mxu0 %v26_v48  ;;  %152 = vmatpush.msra.mxu1 %v78_v51  ;;  %v117_v59 = vld [vmem:[%s699_s4 + $0x198] sm:$0xff]  ;;  %v72_v11 = vld [vmem:[%s699_s4 + $0x30] sm:$0xff]  ;;  %v66_v13 = vld [vmem:[%s699_s4] sm:$0xff] }
  0x1f   :  { %172 = vmatpush.msra.mxu2 %v79_v53  ;;  %192 = vmatpush.msra.mxu3 %v80_v55  ;;  %v113_v60 = vld [vmem:[%s699_s4 + $0x178] sm:$0xff]  ;;  %v67_v14 = vld [vmem:[%s699_s4 + $0x8] sm:$0xff]  ;;  %v68_v15 = vld [vmem:[%s699_s4 + $0x10] sm:$0xff] }
  0x20   :  { %60 = vmatpush.msra.mxu0 %v25_v52  ;;  %v109_v61 = vld [vmem:[%s699_s4 + $0x158] sm:$0xff]  ;;  %153 = vmatpush.msra.mxu1 %v74_v5  ;;  %v330_v17 = vld [vmem:[%s698_s3] ss:$0 sm:$0xff] }
  0x21   :  { %61 = vmatmul.f32.vlgmr.msra.gmra.mxu0 %v24_v54  ;;  %v105_v62 = vld [vmem:[%s699_s4 + $0x138] sm:$0xff]  ;;  %173 = vmatpush.msra.mxu2 %v75_v6  ;;  %v130_v21 = vld [vmem:[%s700_s5] sm:$0xf] }
  0x22   :  { %200 = vmatpush.msrb.mxu0 %v129_v56  ;;  %v101_v63 = vld [vmem:[%s699_s4 + $0x118] sm:$0xff]  ;;  %193 = vmatpush.msra.mxu3 %v76_v7  ;;  %v132_v22 = vperm.slane %v130_v21, 0  ;;  %v135_v23 = vperm.slane %v130_v21, 3  ;;  %v133_v29 = vperm.slane %v130_v21, 1  ;;  %v134_v31 = vperm.slane %v130_v21, 2 }
  0x23   :  { %v97_v0 = vld [vmem:[%s699_s4 + $0xf8] sm:$0xff]  ;;  %154 = vmatpush.msra.mxu1 %v70_v9  ;;  %174 = vmatpush.msra.mxu2 %v71_v10 }
  0x24   :  { %201 = vmatpush.msrb.mxu0 %v125_v57  ;;  %v93_v1 = vld [vmem:[%s699_s4 + $0xd8] sm:$0xff]  ;;  %194 = vmatpush.msra.mxu3 %v72_v11 }
  0x25   :  { %v89_v2 = vld [vmem:[%s699_s4 + $0xb8] sm:$0xff]  ;;  %155 = vmatpush.msra.mxu1 %v66_v13  ;;  %175 = vmatpush.msra.mxu2 %v67_v14 }
  0x26   :  { %202 = vmatpush.msrb.mxu0 %v121_v58  ;;  %v85_v3 = vld [vmem:[%s699_s4 + $0x98] sm:$0xff]  ;;  %195 = vmatpush.msra.mxu3 %v68_v15 }
  0x27   :  { %v81_v4 = vld [vmem:[%s699_s4 + $0x78] sm:$0xff] }
  0x28   :  { %203 = vmatpush.msrb.mxu0 %v117_v59  ;;  %v77_v8 = vld [vmem:[%s699_s4 + $0x58] sm:$0xff] }
  0x29   :  { %v73_v12 = vld [vmem:[%s699_s4 + $0x38] sm:$0xff] }
  0x2a   :  { %204 = vmatpush.msrb.mxu0 %v113_v60  ;;  %v69_v16 = vld [vmem:[%s699_s4 + $0x18] sm:$0xff] }
  0x2c   :  { %205 = vmatpush.msrb.mxu0 %v109_v61 }
  0x2e   :  { %206 = vmatpush.msrb.mxu0 %v105_v62 }
  0x30   :  { %207 = vmatpush.msrb.mxu0 %v101_v63 }
  0x32   :  { %208 = vmatpush.msrb.mxu0 %v97_v0 }
  0x34   :  { %209 = vmatpush.msrb.mxu0 %v93_v1 }
  0x36   :  { %210 = vmatpush.msrb.mxu0 %v89_v2 }
  0x38   :  { %211 = vmatpush.msrb.mxu0 %v85_v3 }
  0x3a   :  { %212 = vmatpush.msrb.mxu0 %v81_v4 }
  0x3c   :  { %213 = vmatpush.msrb.mxu0 %v77_v8 }
  0x3e   :  { %214 = vmatpush.msrb.mxu0 %v73_v12 }
  0x40   :  { %215 = vmatpush.msrb.mxu0 %v69_v16  ;;  %v296_v16 = vld [vmem:[%s696_s1] sm:$0xff] }
  0x9e   :  { %v62_v18 = vpop.f32.mrf.mxu0 }
  0x9f   :  { %v63_v19 = vadd.f32 %v330_v17, %v62_v18  ;;  %v297_v17 = vld [vmem:[%s696_s1 + $0x8] sm:$0xff] }
  0xa1   :  { %v65_v20 = vmax.f32 %v63_v19, 0.0 }
  0xa3   :  { %156 = vmatmul.f32.vlgmr.msra.gmra.mxu1 %v65_v20  ;;  %176 = vmatmul.f32.vlgmr.msra.gmra.mxu2 %v65_v20 }
  0xa4   :  { %196 = vmatmul.f32.vlgmr.msra.gmra.mxu3 %v65_v20  ;;  %216 = vmatmul.f32.vlgmr.msrb.gmra.mxu0 %v65_v20 }
 0x120   :  { %v157_v24 = vpop.f32.mrf.mxu1 }
 0x121   :  { %v158_v25 = vadd.f32 %v157_v24, %v132_v22  ;;  %v217_v26 = vpop.f32.mrf.mxu0  ;;  %v298_v24 = vld [vmem:[%s696_s1 + $0x10] sm:$0xff] }
 0x122   :  { %v218_v27 = vadd.f32 %v217_v26, %v135_v23 }
 0x123   :  { %v325_v28 = vmul.f32 -1.442695, %v158_v25 }
 0x124   :  { %v328_v30 = vmul.f32 -1.442695, %v218_v27 }
 0x125   :  { %331 = vpow2.f32 %v325_v28 }
 0x126   :  { %333 = vpow2.f32 %v328_v30  ;;  %v177_v32 = vpop.f32.mrf.mxu2 }
 0x127   :  { %v178_v33 = vadd.f32 %v177_v32, %v133_v29  ;;  %v197_v34 = vpop.f32.mrf.mxu3  ;;  %v299_v29 = vld [vmem:[%s696_s1 + $0x18] sm:$0xff] }
 0x128   :  { %v198_v35 = vadd.f32 %v197_v34, %v134_v31 }
 0x129   :  { %v326_v36 = vmul.f32 -1.442695, %v178_v33 }
 0x12a   :  { %v327_v37 = vmul.f32 -1.442695, %v198_v35 }
 0x12b   :  { %v332_v38 = vpop.eup %331  ;;  %335 = vpow2.f32 %v326_v36 }
 0x12c   :  { %v334_v39 = vpop.eup %333  ;;  %v232_v40 = vadd.f32 1.0, %v332_v38  ;;  %337 = vpow2.f32 %v327_v37 }
 0x12d   :  { %v658_v41 = vadd.f32 1.0, %v334_v39 }
 0x12e   :  { %339 = vrcp.f32 %v232_v40  ;;  %vm241_vm1 = vweird.f32 %v232_v40  ;;  %v247_v58 = vand.u32 2147483648, %v232_v40  ;;  %v245_v60 = vand.u32 2147483647, %v232_v40 }
 0x12f   :  { %341 = vrcp.f32 %v658_v41  ;;  %vm286_vm2 = vweird.f32 %v658_v41  ;;  %v292_v63 = vand.u32 2147483648, %v658_v41  ;;  %v290_v12 = vand.u32 2147483647, %v658_v41 }
 0x130   :  { %v248_v7 = vor.u32 1.1754944e-38, %v247_v58  ;;  %vm246_vm8 = vcmp.eq.f32.partialorder %v245_v60, 8.507059e+37 }
 0x131   :  { %v336_v42 = vpop.eup %335  ;;  %v293_v23 = vor.u32 1.1754944e-38, %v292_v63  ;;  %vm291_vm15 = vcmp.eq.f32.partialorder %v290_v12, 8.507059e+37 }
 0x132   :  { %v338_v43 = vpop.eup %337  ;;  %v233_v44 = vadd.f32 1.0, %v336_v42 }
 0x133   :  { %v234_v45 = vadd.f32 1.0, %v338_v43 }
 0x134   :  { %v340_v46 = vpop.eup %339  ;;  %343 = vrcp.f32 %v233_v44  ;;  %v262_v62 = vand.u32 2147483648, %v233_v44  ;;  %v260_v2 = vand.u32 2147483647, %v233_v44  ;;  %vm256_vm7 = vweird.f32 %v233_v44 }
 0x135   :  { %v342_v47 = vpop.eup %341  ;;  %v237_v48 = vmul.f32 %v340_v46, %v232_v40  ;;  %345 = vrcp.f32 %v234_v45  ;;  %vm242_vm0 = vweird.f32 %v340_v46  ;;  %v277_v3 = vand.u32 2147483648, %v234_v45 }
 0x136   :  { %v282_v49 = vmul.f32 %v342_v47, %v658_v41  ;;  %vm664_vm3 = vmor %vm241_vm1, %vm242_vm0  ;;  %vm287_vm4 = vweird.f32 %v342_v47  ;;  %v275_v9 = vand.u32 2147483647, %v234_v45  ;;  %v263_v14 = vor.u32 1.1754944e-38, %v262_v62 }
 0x137   :  { %v238_v50 = vsub.f32 1.0, %v237_v48  ;;  %vm672_vm9 = vmor %vm286_vm2, %vm287_vm4  ;;  %vm271_vm11 = vweird.f32 %v234_v45  ;;  %vm261_vm12 = vcmp.eq.f32.partialorder %v260_v2, 8.507059e+37  ;;  %v278_v19 = vor.u32 1.1754944e-38, %v277_v3 }
 0x138   :  { %v283_v51 = vsub.f32 1.0, %v282_v49  ;;  %vm276_vm14 = vcmp.eq.f32.partialorder %v275_v9, 8.507059e+37 }
 0x139   :  { %v239_v52 = vmul.f32 %v340_v46, %v238_v50 }
 0x13a   :  { %v344_v53 = vpop.eup %343  ;;  %v284_v57 = vmul.f32 %v342_v47, %v283_v51 }
 0x13b   :  { %v346_v54 = vpop.eup %345  ;;  %v252_v55 = vmul.f32 %v344_v53, %v233_v44  ;;  %v240_v56 = vadd.f32 %v340_v46, %v239_v52  ;;  %vm257_vm5 = vweird.f32 %v344_v53 }
 0x13c   :  { %v267_v59 = vmul.f32 %v346_v54, %v234_v45  ;;  %v285_v6 = vadd.f32 %v342_v47, %v284_v57  ;;  %vm272_vm6 = vweird.f32 %v346_v54  ;;  %vm258_vm10 = vmor %vm256_vm7, %vm257_vm5 }
 0x13d   :  { %v253_v61 = vsub.f32 1.0, %v252_v55  ;;  %v244_v5 = vsel %vm664_vm3, %v340_v46, %v240_v56  ;;  %vm273_vm13 = vmor %vm271_vm11, %vm272_vm6 }
 0x13e   :  { %v268_v0 = vsub.f32 1.0, %v267_v59  ;;  %v249_v13 = vsel %vm246_vm8, %v248_v7, %v244_v5  ;;  %v289_v20 = vsel %vm672_vm9, %v342_v47, %v285_v6 }
 0x13f   :  { %v254_v4 = vmul.f32 %v344_v53, %v253_v61  ;;  %v300_v26 = vmul.f32 %v296_v16, %v249_v13  ;;  %v294_v28 = vsel %vm291_vm15, %v293_v23, %v289_v20 }
 0x140   :  { %v269_v8 = vmul.f32 %v346_v54, %v268_v0  ;;  %v303_v32 = vmul.f32 %v299_v29, %v294_v28 }
 0x141   :  { %v255_v10 = vadd.f32 %v344_v53, %v254_v4 }
 0x142   :  { %v270_v15 = vadd.f32 %v346_v54, %v269_v8 }
 0x143   :  { %v259_v18 = vsel %vm258_vm10, %v344_v53, %v255_v10 }
 0x144   :  { %v264_v21 = vsel %vm261_vm12, %v263_v14, %v259_v18  ;;  %v274_v22 = vsel %vm273_vm13, %v346_v54, %v270_v15 }
 0x145   :  { %v279_v25 = vsel %vm276_vm14, %v278_v19, %v274_v22  ;;  %v301_v27 = vmul.f32 %v297_v17, %v264_v21 }
 0x146   :  { %v302_v30 = vmul.f32 %v298_v24, %v279_v25 }
 0x147   :  { %v304_v31 = vadd.f32 %v301_v27, %v300_v26 }
 0x149   :  { %v305_v33 = vadd.f32 %v304_v31, %v302_v30 }
 0x14b   :  { %v306_v34 = vadd.f32 %v305_v33, %v303_v32 }
 0x14d   :  { %v307_v35 = vmul.f32 3.0, %v306_v34 }
 0x14f   :  { %308 = vst [vmem:[#allocation2] sm:$0xff] %v307_v35 }
 0x150   :  { %319 = dma.vmem_to_hbm [thread:$0]  %s315_s19, 128, %s317_s22, [#allocation3]  }
 0x151   :  { %371 = dma.done.wait [#allocation3], 128  }
 0x152   :  { %372 = vsyncadd [#allocation3], 4294967168 }
 0x153   :  { %324 = vsyncpa [#allocation3], 1 }

</bundles_post_ra>
